<compile_context>
chip_gen: v7x
topology: tpu7x:2x2x1
jax: 0.10.0
libtpu: 0.0.40
codegen_flags: <defaults>
</compile_context>

<pallas_src>
import jax
import jax.numpy as jnp
from jax.experimental import pallas as pl
from jax.experimental.pallas import tpu as pltpu


def cbow_kernel(idx_ref, weff_ref, b1_ref, w2_ref, b2_ref, o_ref):
    # idx_ref : (TB, C)     int32   word indices for this batch tile
    # weff_ref: (C, Vp, H)  bf16    folded embedding*W1 slabs (Vp = 128-padded V)
    # b1_ref  : (1, H)      f32
    # w2_ref  : (H, Vp)     bf16
    # b2_ref  : (1, Vp)     f32     (padded vocab columns = -1e30)
    # o_ref   : (TB, Vp)    f32     log-probs
    TB, C = idx_ref.shape
    _, Vp, H = weff_ref.shape

    idx = idx_ref[...]                                            # (TB, C) int32
    lane = jax.lax.broadcasted_iota(jnp.int32, (TB, Vp), 1)       # (TB, Vp)

    # Fused gather + linear1: h = sum_c onehot(idx[:, c]) @ W_eff[c]
    # Each matmul is (TB,128) @ (128,128) bf16 -> f32 accumulate.
    h = jnp.zeros((TB, H), jnp.float32)
    for c in range(C):                                            # static, tiny C
        onehot = (idx[:, c:c + 1] == lane).astype(jnp.bfloat16)   # (TB, Vp)
        h = h + jnp.dot(onehot, weff_ref[c],
                        preferred_element_type=jnp.float32)       # (TB, H)

    h = jnp.maximum(h + b1_ref[...], 0.0)                         # bias + ReLU, f32

    logits = jnp.dot(h.astype(jnp.bfloat16), w2_ref[...],
                     preferred_element_type=jnp.float32) + b2_ref[...]

    # Numerically stable log-softmax in f32.  Padded vocab columns carry a
    # -1e30 f32 bias, so they can never be the row max and exp() underflows
    # to 0 in the normalizer.
    m = jnp.max(logits, axis=-1, keepdims=True)
    s = logits - m
    lse = jnp.log(jnp.sum(jnp.exp(s), axis=-1, keepdims=True))
    o_ref[...] = s - lse


def cbow_forward_batched(indices, emb_table, w1, b1, w2, b2, *, batch_tile=128):
    """indices: (B, C) int word ids.  Returns (B, V) f32 log-probs."""
    B, C = indices.shape
    V, D = emb_table.shape
    H = w1.shape[1]
    assert w1.shape[0] == C * D and w2.shape == (H, V)
    assert batch_tile % 8 == 0

    LANES = 128
    SUB = 8
    Vp = pl.cdiv(V, LANES) * LANES
    # Clamp the tile to the rows actually present (multiple of 8), then pad B.
    tb = max(SUB, min(batch_tile, pl.cdiv(B, SUB) * SUB))
    B_pad = pl.cdiv(B, tb) * tb

    # --- wrapper-side (one-time, tiny) preprocessing -------------------------
    # Fold the embedding table into W1: W_eff[c] = emb_pad @ w1[c*D:(c+1)*D].
    emb_p = jnp.zeros((Vp, D), jnp.float32).at[:V, :].set(emb_table.astype(jnp.float32))
    w1_f = w1.astype(jnp.float32)
    weff = jnp.stack([emb_p @ w1_f[c * D:(c + 1) * D, :] for c in range(C)],
                     axis=0).astype(jnp.bfloat16)                 # (C, Vp, H)

    # Pad batch rows (with valid index 0) — padded rows are sliced off below.
    idx_p = jnp.zeros((B_pad, C), jnp.int32).at[:B].set(indices.astype(jnp.int32))

    # Lane-padded second linear; padded bias cols get -1e30 (stays in f32).
    w2_p = jnp.zeros((H, Vp), jnp.float32).at[:, :V].set(w2.astype(jnp.float32))
    w2_bf = w2_p.astype(jnp.bfloat16)
    b2_p = jnp.full((1, Vp), -1e30, jnp.float32).at[:, :V].set(
        b2.reshape(1, V).astype(jnp.float32))
    b1_f = b1.reshape(1, H).astype(jnp.float32)

    out = pl.pallas_call(
        cbow_kernel,
        out_shape=jax.ShapeDtypeStruct((B_pad, Vp), jnp.float32),
        grid=(B_pad // tb,),
        in_specs=[
            pl.BlockSpec((tb, C), lambda i: (i, 0)),         # word indices
            pl.BlockSpec((C, Vp, H), lambda i: (0, 0, 0)),   # folded emb@W1
            pl.BlockSpec((1, H), lambda i: (0, 0)),          # b1
            pl.BlockSpec((H, Vp), lambda i: (0, 0)),         # w2 (lane padded)
            pl.BlockSpec((1, Vp), lambda i: (0, 0)),         # b2 (lane padded)
        ],
        out_specs=pl.BlockSpec((tb, Vp), lambda i: (i, 0)),
        compiler_params=pltpu.CompilerParams(
            dimension_semantics=("parallel",)),
    )(idx_p, weff, b1_f, w2_bf, b2_p)

    return out[:B, :V]


def cbow_forward(inputs, emb_table, w1, b1, w2, b2):
    """Matches CBOW.forward: inputs (C,) int -> (1, V) log-probs."""
    return cbow_forward_batched(inputs.reshape(1, -1), emb_table, w1, b1, w2, b2)


def reference_forward(indices, emb_table, w1, b1, w2, b2):
    """Pure-JAX reference mirroring the kernel's folded bf16/f32 math."""
    B, C = indices.shape
    V, D = emb_table.shape
    H = w1.shape[1]
    w1_f = w1.astype(jnp.float32)
    weff = jnp.stack([emb_table.astype(jnp.float32) @ w1_f[c * D:(c + 1) * D, :]
                      for c in range(C)], axis=0).astype(jnp.bfloat16)  # (C, V, H)
    h = jnp.zeros((B, H), jnp.float32)
    for c in range(C):
        h = h + weff[c][indices[:, c]].astype(jnp.float32)
    h = jnp.maximum(h + b1.reshape(1, -1), 0.0)
    logits = jnp.dot(h.astype(jnp.bfloat16), w2.astype(jnp.bfloat16),
                     preferred_element_type=jnp.float32) + b2.reshape(1, -1)
    return jax.nn.log_softmax(logits, axis=-1)


if __name__ == "__main__":
    raw_text = (
        'We are about to study the idea of a computational process.\n'
        'Computational processes are abstract beings that inhabit computers.\n'
        'As they evolve, processes manipulate other abstract things called data.\n'
        'The evolution of a process is directed by a pattern of rules\n'
        'called a program. People create programs to direct processes. In effect,\n'
        'we conjure the spirits of the computer with our spells.'
    ).split()

    # deterministic vocab ordering (Python set order is hash-randomized)
    vocab = sorted(set(raw_text))
    word_to_ix = {word: i for i, word in enumerate(vocab)}
    vocab_size = len(vocab)

    CONTEXT_SIZE = 4
    EMBEDDING_DIM = 10
    HIDDEN = 128

    test = ['We', 'are', 'to', 'study']
    inputs = jnp.array([word_to_ix[w] for w in test], dtype=jnp.int32)

    # Deterministic parameter init (shapes follow nn.Embedding / nn.Linear;
    # Linear weights stored transposed, i.e. (in_features, out_features)).
    key = jax.random.PRNGKey(0)
    k_emb, k_w1, k_b1, k_w2, k_b2 = jax.random.split(key, 5)
    emb_table = jax.random.normal(k_emb, (vocab_size, EMBEDDING_DIM), jnp.float32)
    w1 = jax.random.normal(k_w1, (CONTEXT_SIZE * EMBEDDING_DIM, HIDDEN), jnp.float32) * 0.1
    b1 = jax.random.normal(k_b1, (1, HIDDEN), jnp.float32) * 0.1
    w2 = jax.random.normal(k_w2, (HIDDEN, vocab_size), jnp.float32) * 0.1
    b2 = jax.random.normal(k_b2, (1, vocab_size), jnp.float32) * 0.1

    # 1) single example, same semantics as the PyTorch module's forward
    log_probs = cbow_forward(inputs, emb_table, w1, b1, w2, b2)
    jax.block_until_ready(log_probs)
    assert log_probs.shape == (1, vocab_size)
    assert jnp.allclose(jnp.sum(jnp.exp(log_probs)), 1.0, atol=1e-4)

    # 2) batched: all (left2, right2) contexts from the text in one kernel call
    contexts = []
    for i in range(2, len(raw_text) - 2):
        contexts.append([word_to_ix[raw_text[i - 2]], word_to_ix[raw_text[i - 1]],
                         word_to_ix[raw_text[i + 1]], word_to_ix[raw_text[i + 2]]])
    batch_idx = jnp.array(contexts, dtype=jnp.int32)          # (B, 4)

    batch_logp = cbow_forward_batched(batch_idx, emb_table, w1, b1, w2, b2)
    jax.block_until_ready(batch_logp)
    assert batch_logp.shape == (batch_idx.shape[0], vocab_size)
    assert jnp.allclose(jnp.sum(jnp.exp(batch_logp), axis=-1), 1.0, atol=1e-4)

    # reference check (mirrors the kernel's folded bf16 matmuls / f32 accum)
    ref_single = reference_forward(inputs.reshape(1, -1), emb_table, w1, b1, w2, b2)
    ref_batch = reference_forward(batch_idx, emb_table, w1, b1, w2, b2)
    assert jnp.allclose(log_probs, ref_single, atol=2e-2)
    assert jnp.allclose(batch_logp, ref_batch, atol=2e-2)
    # batched row 0 is exactly the test context
    assert jnp.allclose(batch_logp[0], log_probs[0], atol=1e-4)
    assert bool(jnp.all(jnp.isfinite(batch_logp)))

    print("KERNEL_OK")
</pallas_src>

<mosaic_0001>
module attributes {stable_mosaic.version = 11 : i64} {
  func.func @cbow_kernel(%arg0: i32, %arg1: memref<8x4xi32, #tpu.memory_space<vmem>>, %arg2: memref<4x128x128xbf16, #tpu.memory_space<vmem>>, %arg3: memref<1x128xf32, #tpu.memory_space<vmem>>, %arg4: memref<128x128xbf16, #tpu.memory_space<vmem>>, %arg5: memref<1x128xf32, #tpu.memory_space<vmem>>, %arg6: memref<8x128xf32, #tpu.memory_space<vmem>>) attributes {dimension_semantics = [#tpu.dimension_semantics<parallel>], iteration_bounds = array<i64: 1>, scalar_prefetch = 0 : i64, scratch_operands = 0 : i64, tpu.core_type = #tpu.core_type<tc>, window_params = [{transform_indices = @transform_0, window_bounds = array<i64: 8, 4>}, {pipeline_mode = #tpu.pipeline_mode<synchronous>, transform_indices = @transform_1, window_bounds = array<i64: 4, 128, 128>}, {pipeline_mode = #tpu.pipeline_mode<synchronous>, transform_indices = @transform_2, window_bounds = array<i64: 1, 128>}, {pipeline_mode = #tpu.pipeline_mode<synchronous>, transform_indices = @transform_3, window_bounds = array<i64: 128, 128>}, {pipeline_mode = #tpu.pipeline_mode<synchronous>, transform_indices = @transform_4, window_bounds = array<i64: 1, 128>}, {transform_indices = @transform_5, window_bounds = array<i64: 8, 128>}]} {
    %c0 = arith.constant 0 : index
    %c0_0 = arith.constant 0 : index
    %0 = vector.load %arg1[%c0, %c0_0] : memref<8x4xi32, #tpu.memory_space<vmem>>, vector<8x4xi32>
    %1 = tpu.iota {dimensions = array<i32: 1>} : vector<8x128xi32>
    %cst = arith.constant 0.000000e+00 : f32
    %2 = vector.broadcast %cst : f32 to vector<8x128xf32>
    %3 = vector.extract_strided_slice %0 {offsets = [0, 0], sizes = [8, 1], strides = [1, 1]} : vector<8x4xi32> to vector<8x1xi32>
    %4 = vector.broadcast %3 : vector<8x1xi32> to vector<8x128xi32>
    %5 = arith.cmpi eq, %4, %1 : vector<8x128xi32>
    %6 = arith.extui %5 : vector<8x128xi1> to vector<8x128xi32>
    %7 = arith.sitofp %6 : vector<8x128xi32> to vector<8x128xf32>
    %8 = arith.truncf %7 : vector<8x128xf32> to vector<8x128xbf16>
    %c0_1 = arith.constant 0 : index
    %c0_2 = arith.constant 0 : index
    %c0_3 = arith.constant 0 : index
    %9 = vector.load %arg2[%c0_1, %c0_2, %c0_3] : memref<4x128x128xbf16, #tpu.memory_space<vmem>>, vector<1x128x128xbf16>
    %10 = vector.shape_cast %9 : vector<1x128x128xbf16> to vector<128x128xbf16>
    %cst_4 = arith.constant dense<0.000000e+00> : vector<8x128xf32>
    %11 = tpu.matmul %8, %10, %cst_4 {dimension_numbers = #tpu.dot_dimension_numbers<[1], [0], [0], [1], [0, 0, 1, 1], [], []>} : vector<8x128xbf16>, vector<128x128xbf16>, vector<8x128xf32> -> vector<8x128xf32>
    %12 = arith.addf %2, %11 : vector<8x128xf32>
    %13 = vector.extract_strided_slice %0 {offsets = [0, 1], sizes = [8, 1], strides = [1, 1]} : vector<8x4xi32> to vector<8x1xi32>
    %14 = vector.broadcast %13 : vector<8x1xi32> to vector<8x128xi32>
    %15 = arith.cmpi eq, %14, %1 : vector<8x128xi32>
    %16 = arith.extui %15 : vector<8x128xi1> to vector<8x128xi32>
    %17 = arith.sitofp %16 : vector<8x128xi32> to vector<8x128xf32>
    %18 = arith.truncf %17 : vector<8x128xf32> to vector<8x128xbf16>
    %c1 = arith.constant 1 : index
    %c0_5 = arith.constant 0 : index
    %c0_6 = arith.constant 0 : index
    %19 = vector.load %arg2[%c1, %c0_5, %c0_6] : memref<4x128x128xbf16, #tpu.memory_space<vmem>>, vector<1x128x128xbf16>
    %20 = vector.shape_cast %19 : vector<1x128x128xbf16> to vector<128x128xbf16>
    %cst_7 = arith.constant dense<0.000000e+00> : vector<8x128xf32>
    %21 = tpu.matmul %18, %20, %cst_7 {dimension_numbers = #tpu.dot_dimension_numbers<[1], [0], [0], [1], [0, 0, 1, 1], [], []>} : vector<8x128xbf16>, vector<128x128xbf16>, vector<8x128xf32> -> vector<8x128xf32>
    %22 = arith.addf %12, %21 : vector<8x128xf32>
    %23 = vector.extract_strided_slice %0 {offsets = [0, 2], sizes = [8, 1], strides = [1, 1]} : vector<8x4xi32> to vector<8x1xi32>
    %24 = vector.broadcast %23 : vector<8x1xi32> to vector<8x128xi32>
    %25 = arith.cmpi eq, %24, %1 : vector<8x128xi32>
    %26 = arith.extui %25 : vector<8x128xi1> to vector<8x128xi32>
    %27 = arith.sitofp %26 : vector<8x128xi32> to vector<8x128xf32>
    %28 = arith.truncf %27 : vector<8x128xf32> to vector<8x128xbf16>
    %c2 = arith.constant 2 : index
    %c0_8 = arith.constant 0 : index
    %c0_9 = arith.constant 0 : index
    %29 = vector.load %arg2[%c2, %c0_8, %c0_9] : memref<4x128x128xbf16, #tpu.memory_space<vmem>>, vector<1x128x128xbf16>
    %30 = vector.shape_cast %29 : vector<1x128x128xbf16> to vector<128x128xbf16>
    %cst_10 = arith.constant dense<0.000000e+00> : vector<8x128xf32>
    %31 = tpu.matmul %28, %30, %cst_10 {dimension_numbers = #tpu.dot_dimension_numbers<[1], [0], [0], [1], [0, 0, 1, 1], [], []>} : vector<8x128xbf16>, vector<128x128xbf16>, vector<8x128xf32> -> vector<8x128xf32>
    %32 = arith.addf %22, %31 : vector<8x128xf32>
    %33 = vector.extract_strided_slice %0 {offsets = [0, 3], sizes = [8, 1], strides = [1, 1]} : vector<8x4xi32> to vector<8x1xi32>
    %34 = vector.broadcast %33 : vector<8x1xi32> to vector<8x128xi32>
    %35 = arith.cmpi eq, %34, %1 : vector<8x128xi32>
    %36 = arith.extui %35 : vector<8x128xi1> to vector<8x128xi32>
    %37 = arith.sitofp %36 : vector<8x128xi32> to vector<8x128xf32>
    %38 = arith.truncf %37 : vector<8x128xf32> to vector<8x128xbf16>
    %c3 = arith.constant 3 : index
    %c0_11 = arith.constant 0 : index
    %c0_12 = arith.constant 0 : index
    %39 = vector.load %arg2[%c3, %c0_11, %c0_12] : memref<4x128x128xbf16, #tpu.memory_space<vmem>>, vector<1x128x128xbf16>
    %40 = vector.shape_cast %39 : vector<1x128x128xbf16> to vector<128x128xbf16>
    %cst_13 = arith.constant dense<0.000000e+00> : vector<8x128xf32>
    %41 = tpu.matmul %38, %40, %cst_13 {dimension_numbers = #tpu.dot_dimension_numbers<[1], [0], [0], [1], [0, 0, 1, 1], [], []>} : vector<8x128xbf16>, vector<128x128xbf16>, vector<8x128xf32> -> vector<8x128xf32>
    %42 = arith.addf %32, %41 : vector<8x128xf32>
    %c0_14 = arith.constant 0 : index
    %c0_15 = arith.constant 0 : index
    %43 = vector.load %arg3[%c0_14, %c0_15] : memref<1x128xf32, #tpu.memory_space<vmem>>, vector<1x128xf32>
    %44 = vector.broadcast %43 : vector<1x128xf32> to vector<8x128xf32>
    %45 = arith.addf %42, %44 : vector<8x128xf32>
    %cst_16 = arith.constant 0.000000e+00 : f32
    %46 = vector.broadcast %cst_16 : f32 to vector<8x128xf32>
    %47 = arith.maximumf %45, %46 : vector<8x128xf32>
    %48 = arith.truncf %47 : vector<8x128xf32> to vector<8x128xbf16>
    %c0_17 = arith.constant 0 : index
    %c0_18 = arith.constant 0 : index
    %49 = vector.load %arg4[%c0_17, %c0_18] : memref<128x128xbf16, #tpu.memory_space<vmem>>, vector<128x128xbf16>
    %cst_19 = arith.constant dense<0.000000e+00> : vector<8x128xf32>
    %50 = tpu.matmul %48, %49, %cst_19 {dimension_numbers = #tpu.dot_dimension_numbers<[1], [0], [0], [1], [0, 0, 1, 1], [], []>} : vector<8x128xbf16>, vector<128x128xbf16>, vector<8x128xf32> -> vector<8x128xf32>
    %c0_20 = arith.constant 0 : index
    %c0_21 = arith.constant 0 : index
    %51 = vector.load %arg5[%c0_20, %c0_21] : memref<1x128xf32, #tpu.memory_space<vmem>>, vector<1x128xf32>
    %52 = vector.broadcast %51 : vector<1x128xf32> to vector<8x128xf32>
    %53 = arith.addf %50, %52 : vector<8x128xf32>
    %cst_22 = arith.constant dense<0xFF800000> : vector<8xf32>
    %54 = vector.multi_reduction <maximumf>, %53, %cst_22 [1] : vector<8x128xf32> to vector<8xf32>
    %55 = vector.shape_cast %54 : vector<8xf32> to vector<8x1xf32>
    %56 = vector.broadcast %55 : vector<8x1xf32> to vector<8x128xf32>
    %57 = arith.subf %53, %56 : vector<8x128xf32>
    %58 = math.exp %57 : vector<8x128xf32>
    %cst_23 = arith.constant dense<0.000000e+00> : vector<8xf32>
    %59 = vector.multi_reduction <add>, %58, %cst_23 [1] : vector<8x128xf32> to vector<8xf32>
    %60 = vector.shape_cast %59 : vector<8xf32> to vector<8x1xf32>
    %61 = math.log %60 : vector<8x1xf32>
    %62 = vector.broadcast %61 : vector<8x1xf32> to vector<8x128xf32>
    %63 = arith.subf %57, %62 : vector<8x128xf32>
    %c0_24 = arith.constant 0 : index
    %c0_25 = arith.constant 0 : index
    %64 = vector.load %arg6[%c0_24, %c0_25] : memref<8x128xf32, #tpu.memory_space<vmem>>, vector<8x128xf32>
    tpu.vector_store %arg6[%c0_24, %c0_25], %63 {strides = array<i32>} : memref<8x128xf32, #tpu.memory_space<vmem>>, vector<8x128xf32>,
    return
  }
  func.func @transform_0(%arg0: i32) -> (i32, i32) {
    %c0_i32 = arith.constant 0 : i32
    %c0_i32_0 = arith.constant 0 : i32
    return %arg0, %c0_i32 : i32, i32
  }
  func.func @transform_1(%arg0: i32) -> (i32, i32, i32) {
    %c0_i32 = arith.constant 0 : i32
    %c0_i32_0 = arith.constant 0 : i32
    %c0_i32_1 = arith.constant 0 : i32
    %c0_i32_2 = arith.constant 0 : i32
    return %c0_i32, %c0_i32_0, %c0_i32_1 : i32, i32, i32
  }
  func.func @transform_2(%arg0: i32) -> (i32, i32) {
    %c0_i32 = arith.constant 0 : i32
    %c0_i32_0 = arith.constant 0 : i32
    %c0_i32_1 = arith.constant 0 : i32
    return %c0_i32, %c0_i32_0 : i32, i32
  }
  func.func @transform_3(%arg0: i32) -> (i32, i32) {
    %c0_i32 = arith.constant 0 : i32
    %c0_i32_0 = arith.constant 0 : i32
    %c0_i32_1 = arith.constant 0 : i32
    return %c0_i32, %c0_i32_0 : i32, i32
  }
  func.func @transform_4(%arg0: i32) -> (i32, i32) {
    %c0_i32 = arith.constant 0 : i32
    %c0_i32_0 = arith.constant 0 : i32
    %c0_i32_1 = arith.constant 0 : i32
    return %c0_i32, %c0_i32_0 : i32, i32
  }
  func.func @transform_5(%arg0: i32) -> (i32, i32) {
    %c0_i32 = arith.constant 0 : i32
    %c0_i32_0 = arith.constant 0 : i32
    return %arg0, %c0_i32 : i32, i32
  }
}

</mosaic_0001>

<bundles_post_ra>
// kernel: tpu_custom_call.1
= control target key start
LH: loop header
LB: loop body
LE: loop exit
PB: predicated region body
PF: predicated region fallthrough
CT: control target
= control target key end

     0   :  { %10 = vsyncpa [#allocation3], 0  ;;  %s1125_s0 = inlined_call_operand.vmem [shape: s32[8,4], index: 0, kind: input, shape index: {}]   ;;  %s1126_s1 = inlined_call_operand.hbm [shape: bf16[4,128,128], index: 1, kind: input, shape index: {}]   ;;  %s1127_s2 = inlined_call_operand.vmem [shape: f32[1,128], index: 2, kind: input, shape index: {}]   ;;  %s1128_s3 = inlined_call_operand.hbm [shape: bf16[128,128], index: 3, kind: input, shape index: {}]   ;;  %s1129_s4 = inlined_call_operand.vmem [shape: f32[1,128], index: 4, kind: input, shape index: {}]   ;;  %s1130_s5 = inlined_call_operand.hbm [shape: f32[8,128], index: 5, kind: output, shape index: {}]  }
   0x1   :  { %11 = vsyncpa [#allocation6], 0 }
   0x2   :  { %12 = vsyncpa [#allocation4], 0  ;;  %s982_s18 = smov [#allocation2]   ;;  %s910_s22 = scalar_lea.hbm %s1126_s1, 4096 }
   0x3   :  { %s20_s19 = sshll.u32 %s982_s18, 4  ;;  %p911_p0 = scmp.ne.s32.totalorder %s1126_s1, %s910_s22  ;;  %s21_s19 = int_to_ptr.vmem [resolvable:$true] %s20_s19 }
   0x4   :  { %p914_p1 = scmp.lt.u32.totalorder %s910_s22, %s1126_s1 }
   0x6   :  { %p916_p2 = pnand %p914_p1, %p911_p0 }
   0x8   :  { %919 = shalt.err (!%p916_p2)
}
   0x9   :  { %s920_s27 = scalar_lea.vmem %s21_s19, 4096  ;;  %p925_p4 = scmp.lt.s32.totalorder %s21_s19, %s21_s19 }
   0xa   :  { %p921_p3 = scmp.ne.s32.totalorder %s21_s19, %s920_s27  ;;  %p926_p5 = scmp.lt.s32.totalorder %s920_s27, %s920_s27 }
   0xc   :  { %p927_p6 = por %p926_p5, %p925_p4 }
   0xe   :  { %p928_p7 = pnand %p927_p6, %p921_p3 }
  0x10   :  { %931 = shalt.err (!%p928_p7)
}
  0x11   :  { %s983_s28 = smov 64   ;;  %s984_s29 = smov 4  }
  0x12   :  { %26 = dma.hbm_to_vmem [thread:$0]  %s1126_s1, 4096, %s21_s19, [#allocation3], %s983_s28, %s983_s28, %s984_s29  }
  0x13   :  { %s985_s7 = smov [#allocation5]   ;;  %s932_s11 = scalar_lea.hbm %s1128_s3, 1024 }
  0x14   :  { %s34_s8 = sshll.u32 %s985_s7, 4  ;;  %p933_p8 = scmp.ne.s32.totalorder %s1128_s3, %s932_s11  ;;  %s35_s8 = int_to_ptr.vmem [resolvable:$true] %s34_s8 }
  0x15   :  { %p936_p9 = scmp.lt.u32.totalorder %s932_s11, %s1128_s3 }
  0x17   :  { %p938_p10 = pnand %p936_p9, %p933_p8 }
  0x19   :  { %941 = shalt.err (!%p938_p10)
}
  0x1a   :  { %s942_s16 = scalar_lea.vmem %s35_s8, 1024  ;;  %p947_p12 = scmp.lt.s32.totalorder %s35_s8, %s35_s8 }
  0x1b   :  { %p943_p11 = scmp.ne.s32.totalorder %s35_s8, %s942_s16  ;;  %p948_p13 = scmp.lt.s32.totalorder %s942_s16, %s942_s16 }
  0x1d   :  { %p949_p0 = por %p948_p13, %p947_p12 }
  0x1f   :  { %p950_p1 = pnand %p949_p0, %p943_p11 }
  0x21   :  { %953 = shalt.err (!%p950_p1)
}
  0x22   :  { %40 = dma.hbm_to_vmem [thread:$0]  %s1128_s3, 1024, %s35_s8, [#allocation6], %s983_s28, %s983_s28, %s984_s29  }
  0x23   :  { %976 = dma.done.wait [#allocation3], 4096  }
  0x24   :  { %977 = vsyncadd [#allocation3], 4294963200 }
  0x25   :  { %978 = dma.done.wait [#allocation6], 1024  }
  0x26   :  { %979 = vsyncadd [#allocation6], 4294966272  ;;  %v986_v0 = vmov 1   ;;  %v987_v1 = vmov 2   ;;  %v988_v2 = vmov 0.0   ;;  %v50_v3 = vld [vmem:[%s1125_s0] sm:$0xff]  ;;  %v51_v22 = vlaneseq }
  0x27   :  { %861 = vset.pattern.permute.xlu0 %v986_v0  ;;  %863 = vset.pattern.permute.xlu1 %v987_v1  ;;  %v866_v4 = vld [vmem:[#allocation2 + $0x40] sm:$0xff]   ;;  %v867_v5 = vld [vmem:[#allocation2 + $0x48] sm:$0xff]   ;;  %vm989_vm0 = vmmov 0   ;;  %v990_v7 = vmov 0   ;;  %v991_v8 = vmov 3   ;;  %v869_v9 = vld [vmem:[#allocation2 + $0x50] sm:$0xff]  }
  0x28   :  { %749 = vmatprep.subr.bf16.mxu0 %v988_v2  ;;  %769 = vmatprep.subr.bf16.mxu1 %v988_v2  ;;  %v868_v6 = vld [vmem:[#allocation2] sm:$0xff]   ;;  %v870_v10 = vld [vmem:[#allocation2 + $0x8] sm:$0xff]   ;;  %v871_v11 = vld [vmem:[#allocation2 + $0x58] sm:$0xff]   ;;  %v1073_v23 = vand.u32 127, %v51_v22  ;;  %v992_v26 = vmov 1.0|1.0  }
  0x29   :  { %77 = vperm.xlu0 %861, %v50_v3   ;;  %277 = vperm.xlu1 %863, %v50_v3   ;;  %v872_v12 = vld [vmem:[#allocation2 + $0x10] sm:$0xff]   ;;  %v873_v13 = vld [vmem:[#allocation2 + $0x60] sm:$0xff]   ;;  %v874_v14 = vld [vmem:[#allocation2 + $0x18] sm:$0xff]  }
  0x2a   :  { %765 = vmatprep.mubr.msk.bf16.mxu0 %vm989_vm0, %v988_v2  ;;  %785 = vmatprep.mubr.msk.bf16.mxu1 %vm989_vm0, %v988_v2  ;;  %v875_v15 = vld [vmem:[#allocation2 + $0x68] sm:$0xff]   ;;  %v876_v16 = vld [vmem:[#allocation2 + $0x20] sm:$0xff]   ;;  %v877_v17 = vld [vmem:[#allocation2 + $0x70] sm:$0xff]  }
  0x2b   :  { %750 = vmatpush3.bf16.msra.mxu0 %v866_v4  ;;  %770 = vmatpush3.bf16.msra.mxu1 %v868_v6  ;;  %v878_v18 = vld [vmem:[#allocation2 + $0x28] sm:$0xff]   ;;  %v879_v19 = vld [vmem:[#allocation2 + $0x78] sm:$0xff]   ;;  %v880_v20 = vld [vmem:[#allocation2 + $0x30] sm:$0xff]  }
  0x2c   :  { %751 = vmatprep.subr.bf16.mxu0 %v988_v2  ;;  %771 = vmatprep.subr.bf16.mxu1 %v988_v2  ;;  %v882_v21 = vld [vmem:[#allocation2 + $0x38] sm:$0xff]   ;;  %v881_v25 = vld [vmem:[#allocation2 + $0x80] sm:$0xff]   ;;  %v883_v27 = vld [vmem:[#allocation2 + $0x88] sm:$0xff]  }
  0x2d   :  { %862 = vset.pattern.permute.xlu0 %v990_v7  ;;  %864 = vset.pattern.permute.xlu1 %v991_v8  ;;  %v884_v29 = vld [vmem:[#allocation2 + $0xc0] sm:$0xff]   ;;  %v885_v30 = vld [vmem:[#allocation2 + $0x90] sm:$0xff]   ;;  %v886_v31 = vld [vmem:[#allocation2 + $0xc8] sm:$0xff]  }
  0x2e   :  { %54 = vperm.xlu0 %862, %v50_v3   ;;  %390 = vperm.xlu1 %864, %v50_v3   ;;  %v887_v32 = vld [vmem:[#allocation2 + $0x98] sm:$0xff]   ;;  %v888_v33 = vld [vmem:[#allocation2 + $0xd0] sm:$0xff]   ;;  %v889_v34 = vld [vmem:[#allocation2 + $0xa0] sm:$0xff]  }
  0x2f   :  { %752 = vmatpush3.bf16.msra.mxu0 %v867_v5  ;;  %772 = vmatpush3.bf16.msra.mxu1 %v870_v10  ;;  %v890_v35 = vld [vmem:[#allocation2 + $0xd8] sm:$0xff]   ;;  %v891_v36 = vld [vmem:[#allocation2 + $0xa8] sm:$0xff]   ;;  %v892_v37 = vld [vmem:[#allocation2 + $0xe0] sm:$0xff]  }
  0x30   :  { %753 = vmatprep.subr.bf16.mxu0 %v988_v2  ;;  %773 = vmatprep.subr.bf16.mxu1 %v988_v2  ;;  %v893_v38 = vld [vmem:[#allocation2 + $0xb0] sm:$0xff]   ;;  %v894_v39 = vld [vmem:[#allocation2 + $0xe8] sm:$0xff]   ;;  %v895_v41 = vld [vmem:[#allocation2 + $0xb8] sm:$0xff]  }
  0x31   :  { %v896_v42 = vld [vmem:[#allocation2 + $0xf0] sm:$0xff]   ;;  %v897_v44 = vld [vmem:[#allocation2 + $0xf8] sm:$0xff]   ;;  %v898_v45 = vld [vmem:[#allocation5] sm:$0xff]  }
  0x32   :  { %865 = vset.pattern.permute.xlu0 %v991_v8  ;;  %v899_v46 = vld [vmem:[#allocation5 + $0x8] sm:$0xff]   ;;  %v900_v47 = vld [vmem:[#allocation5 + $0x10] sm:$0xff]   ;;  %v901_v48 = vld [vmem:[#allocation5 + $0x18] sm:$0xff]  }
  0x33   :  { %754 = vmatpush3.bf16.msra.mxu0 %v869_v9  ;;  %774 = vmatpush3.bf16.msra.mxu1 %v872_v12  ;;  %v902_v49 = vld [vmem:[#allocation5 + $0x20] sm:$0xff]   ;;  %v903_v50 = vld [vmem:[#allocation5 + $0x28] sm:$0xff]   ;;  %v904_v51 = vld [vmem:[#allocation5 + $0x30] sm:$0xff]  }
  0x34   :  { %755 = vmatprep.subr.bf16.mxu0 %v988_v2  ;;  %775 = vmatprep.subr.bf16.mxu1 %v988_v2  ;;  %v905_v52 = vld [vmem:[#allocation5 + $0x38] sm:$0xff]   ;;  %v695_v12 = vld [vmem:[%s1129_s4] ss:$0 sm:$0xff] }
  0x37   :  { %756 = vmatpush3.bf16.msra.mxu0 %v871_v11  ;;  %776 = vmatpush3.bf16.msra.mxu1 %v874_v14 }
  0x38   :  { %757 = vmatprep.subr.bf16.mxu0 %v988_v2  ;;  %777 = vmatprep.subr.bf16.mxu1 %v988_v2 }
  0x3b   :  { %758 = vmatpush3.bf16.msra.mxu0 %v873_v13  ;;  %778 = vmatpush3.bf16.msra.mxu1 %v876_v16 }
  0x3c   :  { %759 = vmatprep.subr.bf16.mxu0 %v988_v2  ;;  %779 = vmatprep.subr.bf16.mxu1 %v988_v2 }
  0x3f   :  { %760 = vmatpush3.bf16.msra.mxu0 %v875_v15  ;;  %780 = vmatpush3.bf16.msra.mxu1 %v878_v18 }
  0x40   :  { %761 = vmatprep.subr.bf16.mxu0 %v988_v2  ;;  %781 = vmatprep.subr.bf16.mxu1 %v988_v2 }
  0x43   :  { %762 = vmatpush3.bf16.msra.mxu0 %v877_v17  ;;  %782 = vmatpush3.bf16.msra.mxu1 %v880_v20 }
  0x44   :  { %763 = vmatprep.subr.bf16.mxu0 %v988_v2  ;;  %783 = vmatprep.subr.bf16.mxu1 %v988_v2 }
  0x47   :  { %764 = vmatpush3.bf16.msra.mxu0 %v879_v19  ;;  %784 = vmatpush3.bf16.msra.mxu1 %v882_v21 }
  0x48   :  { %789 = vmatprep.subr.bf16.mxu0 %v988_v2  ;;  %809 = vmatprep.subr.bf16.mxu1 %v988_v2 }
  0xa8   :  { %v78_v24 = vpop.permute.xlu0 %77  ;;  %v278_v40 = vpop.permute.xlu1 %277 }
  0xa9   :  { %vm79_vm1 = vcmp.eq.s32.totalorder %v78_v24, %v1073_v23  ;;  %vm279_vm5 = vcmp.eq.s32.totalorder %v278_v40, %v1073_v23 }
  0xaa   :  { %vm660_vm2 = vmpackc.low %vm79_vm1, %vm79_vm1 }
  0xab   :  { %766 = vmatmul.mubr.msk.bf16.vlgmr.msra.gmra.mrb[0].mxu0 %vm660_vm2, %v992_v26  ;;  %vm681_vm6 = vmpackc.low %vm279_vm5, %vm279_vm5 }
  0xac   :  { %790 = vmatpush3.bf16.msra.mxu0 %v881_v25  ;;  %805 = vmatprep.mubr.msk.bf16.mxu0 %vm989_vm0, %v988_v2 }
  0xad   :  { %v55_v28 = vpop.permute.xlu0 %54  ;;  %791 = vmatprep.subr.bf16.mxu0 %v988_v2  ;;  %v391_v43 = vpop.permute.xlu1 %390 }
  0xae   :  { %vm56_vm3 = vcmp.eq.s32.totalorder %v55_v28, %v1073_v23  ;;  %vm392_vm7 = vcmp.eq.s32.totalorder %v391_v43, %v1073_v23 }
  0xaf   :  { %vm670_vm4 = vmpackc.low %vm56_vm3, %vm56_vm3 }
  0xb0   :  { %792 = vmatpush3.bf16.msra.mxu0 %v883_v27  ;;  %786 = vmatmul.mubr.msk.bf16.vlgmr.msra.gmra.mrb[0].mxu1 %vm670_vm4, %v992_v26  ;;  %vm692_vm8 = vmpackc.low %vm392_vm7, %vm392_vm7 }
  0xb1   :  { %810 = vmatpush3.bf16.msra.mxu1 %v884_v29  ;;  %793 = vmatprep.subr.bf16.mxu0 %v988_v2 }
  0xb2   :  { %811 = vmatprep.subr.bf16.mxu1 %v988_v2  ;;  %825 = vmatprep.mubr.msk.bf16.mxu1 %vm989_vm0, %v988_v2 }
  0xb4   :  { %794 = vmatpush3.bf16.msra.mxu0 %v885_v30 }
  0xb5   :  { %812 = vmatpush3.bf16.msra.mxu1 %v886_v31  ;;  %795 = vmatprep.subr.bf16.mxu0 %v988_v2 }
  0xb6   :  { %813 = vmatprep.subr.bf16.mxu1 %v988_v2 }
  0xb8   :  { %796 = vmatpush3.bf16.msra.mxu0 %v887_v32 }
  0xb9   :  { %814 = vmatpush3.bf16.msra.mxu1 %v888_v33  ;;  %797 = vmatprep.subr.bf16.mxu0 %v988_v2 }
  0xba   :  { %815 = vmatprep.subr.bf16.mxu1 %v988_v2 }
  0xbc   :  { %798 = vmatpush3.bf16.msra.mxu0 %v889_v34 }
  0xbd   :  { %816 = vmatpush3.bf16.msra.mxu1 %v890_v35  ;;  %799 = vmatprep.subr.bf16.mxu0 %v988_v2 }
  0xbe   :  { %817 = vmatprep.subr.bf16.mxu1 %v988_v2 }
  0xc0   :  { %800 = vmatpush3.bf16.msra.mxu0 %v891_v36 }
  0xc1   :  { %818 = vmatpush3.bf16.msra.mxu1 %v892_v37  ;;  %801 = vmatprep.subr.bf16.mxu0 %v988_v2 }
  0xc2   :  { %819 = vmatprep.subr.bf16.mxu1 %v988_v2 }
  0xc4   :  { %802 = vmatpush3.bf16.msra.mxu0 %v893_v38 }
  0xc5   :  { %820 = vmatpush3.bf16.msra.mxu1 %v894_v39  ;;  %803 = vmatprep.subr.bf16.mxu0 %v988_v2 }
  0xc6   :  { %821 = vmatprep.subr.bf16.mxu1 %v988_v2 }
  0xc8   :  { %804 = vmatpush3.bf16.msra.mxu0 %v895_v41 }
  0xc9   :  { %822 = vmatpush3.bf16.msra.mxu1 %v896_v42  ;;  %829 = vmatprep.subr.bf16.mxu0 %v988_v2 }
  0xca   :  { %823 = vmatprep.subr.bf16.mxu1 %v988_v2 }
  0xcb   :  { %806 = vmatmul.mubr.msk.bf16.vlgmr.msra.gmra.mrb[4].mxu0 %vm681_vm6, %v992_v26 }
  0xcc   :  { %845 = vmatprep.mubr.msk.bf16.mxu0 %vm989_vm0, %v988_v2  ;;  %830 = vmatpush3.bf16.msra.mxu0 %v898_v45 }
  0xcd   :  { %824 = vmatpush3.bf16.msra.mxu1 %v897_v44  ;;  %831 = vmatprep.subr.bf16.mxu0 %v988_v2 }
  0xd0   :  { %826 = vmatmul.mubr.msk.bf16.vlgmr.msra.gmra.mrb[4].mxu1 %vm692_vm8, %v992_v26  ;;  %832 = vmatpush3.bf16.msra.mxu0 %v899_v46 }
  0xd1   :  { %833 = vmatprep.subr.bf16.mxu0 %v988_v2 }
  0xd4   :  { %834 = vmatpush3.bf16.msra.mxu0 %v900_v47 }
  0xd5   :  { %835 = vmatprep.subr.bf16.mxu0 %v988_v2 }
  0xd8   :  { %836 = vmatpush3.bf16.msra.mxu0 %v901_v48 }
  0xd9   :  { %837 = vmatprep.subr.bf16.mxu0 %v988_v2 }
  0xdc   :  { %838 = vmatpush3.bf16.msra.mxu0 %v902_v49 }
  0xdd   :  { %839 = vmatprep.subr.bf16.mxu0 %v988_v2 }
  0xe0   :  { %840 = vmatpush3.bf16.msra.mxu0 %v903_v50 }
  0xe1   :  { %841 = vmatprep.subr.bf16.mxu0 %v988_v2 }
  0xe4   :  { %842 = vmatpush3.bf16.msra.mxu0 %v904_v51 }
  0xe5   :  { %843 = vmatprep.subr.bf16.mxu0 %v988_v2  ;;  %v694_v2 = vld [vmem:[%s1127_s2] ss:$0 sm:$0xff]  ;;  %s993_s2 = smov [#allocation7]  }
  0xe6   :  { %s640_s22 = sshll.u32 %s993_s2, 4  ;;  %s641_s22 = int_to_ptr.vmem [resolvable:$true] %s640_s22 }
  0xe7   :  { %s954_s4 = scalar_lea.vmem %s641_s22, 128  ;;  %p959_p3 = scmp.lt.s32.totalorder %s641_s22, %s641_s22 }
  0xe8   :  { %844 = vmatpush3.bf16.msra.mxu0 %v905_v52  ;;  %p955_p2 = scmp.ne.s32.totalorder %s641_s22, %s954_s4  ;;  %p960_p4 = scmp.lt.s32.totalorder %s954_s4, %s954_s4 }
  0xea   :  { %p961_p5 = por %p960_p4, %p959_p3 }
  0xec   :  { %p962_p6 = pnand %p961_p5, %p955_p2 }
 0x17e   :  { %v182_v53 = vpop.f32.mrb[0].mxu0 }
 0x17f   :  { %v767_v54 = vpop.f32.mrb[1].mxu0 }
 0x180   :  { %v185_v55 = vpop.f32.mrb[2].mxu0 }
 0x181   :  { %v768_v56 = vpop.f32.mrb[3].mxu0 }
 0x183   :  { %v270_v57 = vpop.f32.mrb[0].mxu1 }
 0x184   :  { %v271_v58 = vadd.f32 %v270_v57, %v182_v53  ;;  %v787_v59 = vpop.f32.mrb[1].mxu1 }
 0x185   :  { %v273_v60 = vpop.f32.mrb[2].mxu1 }
 0x186   :  { %v788_v61 = vpop.f32.mrb[3].mxu1 }
 0x19e   :  { %v382_v62 = vpop.f32.mrb[4].mxu0 }
 0x19f   :  { %v388_v63 = vadd.f32 %v382_v62, %v271_v58  ;;  %v807_v0 = vpop.f32.mrb[5].mxu0 }
 0x1a0   :  { %v385_v1 = vpop.f32.mrb[6].mxu0 }
 0x1a1   :  { %v808_v3 = vpop.f32.mrb[7].mxu0 }
 0x1a3   :  { %v495_v4 = vpop.f32.mrb[4].mxu1 }
 0x1a4   :  { %v501_v5 = vadd.f32 %v495_v4, %v388_v63  ;;  %v827_v6 = vpop.f32.mrb[5].mxu1 }
 0x1a5   :  { %v498_v7 = vpop.f32.mrb[6].mxu1 }
 0x1a6   :  { %v509_v8 = vadd.f32 %v694_v2, %v501_v5  ;;  %v828_v9 = vpop.f32.mrb[7].mxu1 }
 0x1a8   :  { %v510_v10 = vmax.f32 %v509_v8, 0.0 }
 0x1aa   :  { %v511_v11 = vpack.c.bf16 %v510_v10, %v510_v10 }
 0x1ac   :  { %846 = vmatmul.mubr.bf16.vlgmr.msra.gmra.mrb[8].mxu0 %v511_v11 }
 0x27f   :  { %v617_v13 = vpop.f32.mrb[8].mxu0 }
 0x280   :  { %v618_v14 = vadd.f32 %v695_v12, %v617_v13  ;;  %v847_v15 = vpop.f32.mrb[9].mxu0 }
 0x281   :  { %v620_v16 = vpop.f32.mrb[10].mxu0 }
 0x282   :  { %623 = vmax.xlane.f32.xlu1 %v618_v14  ;;  %v848_v17 = vpop.f32.mrb[11].mxu0 }
 0x30f   :  { %v624_v18 = vpop.xlane.xlu1 %623 }
 0x310   :  { %v625_v19 = vsub.f32 %v618_v14, %v624_v18 }
 0x312   :  { %v626_v20 = vmul.f32 1.442695, %v625_v19 }
 0x314   :  { %906 = vpow2.f32 %v626_v20 }
 0x31e   :  { %v907_v21 = vpop.eup %906 }
 0x31f   :  { %628 = vadd.xlane.f32.xlu0 %v907_v21 }
 0x3ac   :  { %v629_v22 = vpop.xlane.xlu0 %628 }
 0x3ad   :  { %908 = vlog2.f32 %v629_v22 }
 0x3b7   :  { %v909_v23 = vpop.eup %908 }
 0x3b8   :  { %v631_v24 = vmul.f32 0.6931472, %v909_v23 }
 0x3ba   :  { %v632_v25 = vsub.f32 %v625_v19, %v631_v24 }
 0x3bc   :  { %633 = vst [vmem:[#allocation7] sm:$0xff] %v632_v25 }
 0x3bd   :  { %965 = shalt.err (!%p962_p6)
}
 0x3be   :  { %s966_s25 = scalar_lea.hbm %s1130_s5, 128 }
 0x3bf   :  { %p967_p7 = scmp.ne.s32.totalorder %s1130_s5, %s966_s25  ;;  %p970_p8 = scmp.lt.u32.totalorder %s966_s25, %s1130_s5 }
 0x3c1   :  { %p972_p9 = pnand %p970_p8, %p967_p7 }
 0x3c3   :  { %975 = shalt.err (!%p972_p9)
}
 0x3c4   :  { %643 = dma.vmem_to_hbm [thread:$0]  %s641_s22, 128, %s1130_s5, [#allocation4]  }
 0x3c5   :  { %980 = dma.done.wait [#allocation4], 128  }
 0x3c6   :  { %981 = vsyncadd [#allocation4], 4294967168 }
 0x3c7   :  { %647 = vsyncpa [#allocation3], 1 }
 0x3c8   :  { %648 = vsyncpa [#allocation6], 1 }
 0x3c9   :  { %649 = vsyncpa [#allocation4], 1 }

</bundles_post_ra>
